<compile_context>
chip_gen: v5e
topology: v5e:2x2
jax: 0.10.0
libtpu: 0.0.40
codegen_flags: <defaults>
</compile_context>

<pallas_src>
import functools

import jax
import jax.numpy as jnp
from jax.experimental import pallas as pl
from jax.experimental.pallas import tpu as pltpu


def _add_noop_bn_kernel(x_ref, scale_ref, bias_ref, o_ref):
    # x_ref: (TR, TL) activations; scale_ref/bias_ref: (TR, 1) float32.
    # The wrapper's `inp + 0` is a no-op and is intentionally not materialized.
    x = x_ref[...].astype(jnp.float32)
    o_ref[...] = (x * scale_ref[...] + bias_ref[...]).astype(o_ref.dtype)


def _round_up(v, m):
    return (v + m - 1) // m * m


def _choose_tiles(rp, lp, itemsize):
    # ~2 MiB per buffer -> 4 buffers (x, out, double-buffered) ~8 MiB, safely
    # under the default scoped VMEM on every generation (16/32/32 MiB).
    tr = min(rp, 512)                          # rp is a multiple of 8
    per_buf_budget = 2 * 1024 * 1024
    max_tl = max(128, (per_buf_budget // (tr * itemsize)) // 128 * 128)
    tl = min(lp, max_tl)                       # lp is a multiple of 128
    return tr, tl


@functools.partial(jax.jit, static_argnames=("eps",))
def add_noop_wrapper_forward(x_nchw, gamma, beta, running_mean, running_var,
                             eps=1e-5):
    """Forward of _AddNoOpWrapper wrapping a BatchNorm2d (eval mode)."""
    N, C, H, W = x_nchw.shape
    R, L = N * C, H * W

    # Per-channel affine, computed in float32 regardless of activation dtype.
    scale_c = gamma.astype(jnp.float32) / jnp.sqrt(
        running_var.astype(jnp.float32) + eps)
    bias_c = beta.astype(jnp.float32) - running_mean.astype(jnp.float32) * scale_c

    x2d = x_nchw.reshape(R, L)
    scale = jnp.tile(scale_c, N).reshape(R, 1)
    bias = jnp.tile(bias_c, N).reshape(R, 1)

    # Pad so tiles are (8, 128)-aligned and stores are lane-dense (no vst.msk).
    Rp, Lp = _round_up(R, 8), _round_up(L, 128)
    if (Rp, Lp) != (R, L):
        x2d = jnp.pad(x2d, ((0, Rp - R), (0, Lp - L)))
        scale = jnp.pad(scale, ((0, Rp - R), (0, 0)))
        bias = jnp.pad(bias, ((0, Rp - R), (0, 0)))

    TR, TL = _choose_tiles(Rp, Lp, x2d.dtype.itemsize)

    out2d = pl.pallas_call(
        _add_noop_bn_kernel,
        out_shape=jax.ShapeDtypeStruct((Rp, Lp), x2d.dtype),
        grid_spec=pltpu.PrefetchScalarGridSpec(
            num_scalar_prefetch=0,
            grid=(pl.cdiv(Rp, TR), pl.cdiv(Lp, TL)),
            in_specs=[
                pl.BlockSpec((TR, TL), lambda i, j: (i, j)),
                pl.BlockSpec((TR, 1), lambda i, j: (i, 0)),
                pl.BlockSpec((TR, 1), lambda i, j: (i, 0)),
            ],
            out_specs=pl.BlockSpec((TR, TL), lambda i, j: (i, j)),
        ),
        compiler_params=pltpu.CompilerParams(
            dimension_semantics=("parallel", "parallel"),
        ),
        # The activation is dead after this op; let XLA reuse its HBM buffer.
        input_output_aliases={0: 0},
    )(x2d, scale, bias)

    return out2d[:R, :L].reshape(N, C, H, W)


if __name__ == "__main__":
    key = jax.random.PRNGKey(0)
    N, C, H, W = 2, 4, 16, 16

    kx, kg, kb, km, kv = jax.random.split(key, 5)
    x = jax.random.normal(kx, (N, C, H, W), dtype=jnp.float32)

    # Deterministic BatchNorm2d parameters for the wrapped module (eval mode).
    gamma = 1.0 + 0.1 * jax.random.normal(kg, (C,), dtype=jnp.float32)
    beta = 0.1 * jax.random.normal(kb, (C,), dtype=jnp.float32)
    running_mean = 0.05 * jax.random.normal(km, (C,), dtype=jnp.float32)
    running_var = 1.0 + 0.1 * jax.random.uniform(kv, (C,), dtype=jnp.float32)

    eps = 1e-5
    # Reference (BatchNorm2d eval semantics applied to (x + 0)), computed first.
    ref = (x + 0 - running_mean[None, :, None, None]) / jnp.sqrt(
        running_var[None, :, None, None] + eps
    ) * gamma[None, :, None, None] + beta[None, :, None, None]
    ref = jax.block_until_ready(ref)

    out = add_noop_wrapper_forward(x, gamma, beta, running_mean, running_var)
    out = jax.block_until_ready(out)

    assert out.shape == (N, C, H, W)
    assert jnp.allclose(out, ref, atol=1e-5, rtol=1e-5)

    print("KERNEL_OK")
</pallas_src>

<mosaic_0001>
module attributes {stable_mosaic.version = 11 : i64} {
  func.func @_add_noop_bn_kernel(%arg0: i32, %arg1: i32, %arg2: memref<8x256xf32, #tpu.memory_space<vmem>>, %arg3: memref<8x1xf32, #tpu.memory_space<vmem>>, %arg4: memref<8x1xf32, #tpu.memory_space<vmem>>, %arg5: memref<8x256xf32, #tpu.memory_space<vmem>>) attributes {dimension_semantics = [#tpu.dimension_semantics<parallel>, #tpu.dimension_semantics<parallel>], iteration_bounds = array<i64: 1, 1>, scalar_prefetch = 0 : i64, scratch_operands = 0 : i64, tpu.core_type = #tpu.core_type<tc>, window_params = [{transform_indices = @transform_0, window_bounds = array<i64: 8, 256>}, {transform_indices = @transform_1, window_bounds = array<i64: 8, 1>}, {transform_indices = @transform_2, window_bounds = array<i64: 8, 1>}, {transform_indices = @transform_3, window_bounds = array<i64: 8, 256>}]} {
    %c0 = arith.constant 0 : index
    %c0_0 = arith.constant 0 : index
    %0 = vector.load %arg2[%c0, %c0_0] : memref<8x256xf32, #tpu.memory_space<vmem>>, vector<8x256xf32>
    %c0_1 = arith.constant 0 : index
    %c0_2 = arith.constant 0 : index
    %1 = vector.load %arg3[%c0_1, %c0_2] : memref<8x1xf32, #tpu.memory_space<vmem>>, vector<8x1xf32>
    %2 = vector.broadcast %1 : vector<8x1xf32> to vector<8x256xf32>
    %3 = arith.mulf %0, %2 : vector<8x256xf32>
    %c0_3 = arith.constant 0 : index
    %c0_4 = arith.constant 0 : index
    %4 = vector.load %arg4[%c0_3, %c0_4] : memref<8x1xf32, #tpu.memory_space<vmem>>, vector<8x1xf32>
    %5 = vector.broadcast %4 : vector<8x1xf32> to vector<8x256xf32>
    %6 = arith.addf %3, %5 : vector<8x256xf32>
    %c0_5 = arith.constant 0 : index
    %c0_6 = arith.constant 0 : index
    %7 = vector.load %arg5[%c0_5, %c0_6] : memref<8x256xf32, #tpu.memory_space<vmem>>, vector<8x256xf32>
    tpu.vector_store %arg5[%c0_5, %c0_6], %6 {strides = array<i32>} : memref<8x256xf32, #tpu.memory_space<vmem>>, vector<8x256xf32>,
    return
  }
  func.func @transform_0(%arg0: i32, %arg1: i32) -> (i32, i32) {
    %c0_i32 = arith.constant 0 : i32
    return %arg0, %arg1 : i32, i32
  }
  func.func @transform_1(%arg0: i32, %arg1: i32) -> (i32, i32) {
    %c0_i32 = arith.constant 0 : i32
    %c0_i32_0 = arith.constant 0 : i32
    return %arg0, %c0_i32 : i32, i32
  }
  func.func @transform_2(%arg0: i32, %arg1: i32) -> (i32, i32) {
    %c0_i32 = arith.constant 0 : i32
    %c0_i32_0 = arith.constant 0 : i32
    return %arg0, %c0_i32 : i32, i32
  }
  func.func @transform_3(%arg0: i32, %arg1: i32) -> (i32, i32) {
    %c0_i32 = arith.constant 0 : i32
    return %arg0, %arg1 : i32, i32
  }
}

</mosaic_0001>

<bundles_post_ra>
// kernel: tile.0
= control target key start
LH: loop header
LB: loop body
LE: loop exit
PB: predicated region body
PF: predicated region fallthrough
CT: control target
= control target key end

     0   :  { %s34_s8 = smov 125   ;;  %s35_s9 = smov 126   ;;  %vm7_vm0 = vcmask 7168   ;;  %s61_s0 = inlined_call_operand.vmem [shape: f32[2,4], index: 0, kind: input, shape index: {}]   ;;  %s62_s1 = inlined_call_operand.vmem [shape: f32[8,1], index: 1, kind: output, shape index: {}]  }
   0x1   :  { %v4_v0 = vld [vmem:[%s61_s0] sm:$0x3]  ;;  %s33_s0 = smov 127  }
   0x2   :  { %5 = vst [vmem:[#allocation0] sm:$0x3] %v4_v0 }
   0x9   :  { %v9_v1 = vld [vmem:[#allocation0] sm:$0x3]  }
   0xa   :  { %v21_v2 = vld [vmem:[#allocation0] sm:$0x3]   ;;  %10 = vrot.lane.b32.xlu0 %v9_v1, %s33_s0 }
   0xb   :  { %22 = vrot.lane.b32.xlu1 %v21_v2, %s34_s8  ;;  %v15_v3 = vld [vmem:[#allocation0] sm:$0x3]  }
   0xc   :  { %v6_v4 = vld [vmem:[#allocation0] sm:$0x3]  }
   0xd   :  { %8 = vst.msk [vmem:[%s62_s1] ss:$4 sm:$0x3] %vm7_vm0, %v6_v4  }
  0x12   :  { %16 = vrot.lane.b32.xlu0 %v15_v3, %s35_s9 }
  0x7c   :  { %v11_v5 = vpop.permute.xlu0 %10  }
  0x7d   :  { %v23_v6 = vpop.permute.xlu1 %22   ;;  %27 = vst.msk [vmem:[%s62_s1 + $0x1] ss:$4 sm:$0x3] %vm7_vm0, %v11_v5  }
  0x7e   :  { %29 = vst.msk [vmem:[%s62_s1 + $0x3] ss:$4 sm:$0x3] %vm7_vm0, %v23_v6  }
  0x84   :  { %v17_v7 = vpop.permute.xlu0 %16  }
  0x85   :  { %28 = vst.msk [vmem:[%s62_s1 + $0x2] ss:$4 sm:$0x3] %vm7_vm0, %v17_v7  }

// kernel: tile.18
= control target key start
LH: loop header
LB: loop body
LE: loop exit
PB: predicated region body
PF: predicated region fallthrough
CT: control target
= control target key end

     0   :  { %s22_s0 = inlined_call_operand.vmem [shape: f32[4], index: 0, kind: input, shape index: {}]   ;;  %s23_s1 = inlined_call_operand.vmem [shape: f32[2,4], index: 1, kind: output, shape index: {}]  }
   0x1   :  { %v4_v0 = vld [vmem:[%s22_s0] ss:$0 sm:$0xff] }
   0x2   :  { %5 = vst [vmem:[%s23_s1] sm:$0x3] %v4_v0 }

</bundles_post_ra>
